<compile_context>
chip_gen: v6e
topology: v6e:2x2x1
jax: 0.10.0
libtpu: 0.0.40
codegen_flags: <defaults>
</compile_context>

<pallas_src>
import functools
import math

import jax
import jax.numpy as jnp
from jax.experimental import pallas as pl
from jax.experimental.pallas import tpu as pltpu

# 0.5*log(2*pi) from Normal.log_prob plus 2*log(2) from the tanh correction.
_LOGPROB_CONST = 0.5 * math.log(2.0 * math.pi) + 2.0 * math.log(2.0)


def _round_up(x, m):
    return ((x + m - 1) // m) * m


def _actor_kernel(max_action, n_actions, stochastic, *refs):
    """Fused MXU+VPU block: fc1->relu->fc2->relu->fc3->sample->log_pi."""
    if stochastic:
        (s_ref, eps_ref, w1_ref, b1_ref, w2_ref, b2_ref,
         w3_ref, b3_ref, std_ref, const_ref, out_ref) = refs
    else:
        (s_ref, w1_ref, b1_ref, w2_ref, b2_ref,
         w3_ref, b3_ref, std_ref, const_ref, out_ref) = refs

    # Three matmuls on the MXU: bf16 operands, f32 accumulation.
    h1 = jnp.dot(s_ref[...], w1_ref[...],
                 preferred_element_type=jnp.float32) + b1_ref[...]
    h1 = jnp.maximum(h1, 0.0)
    h2 = jnp.dot(h1.astype(jnp.bfloat16), w2_ref[...],
                 preferred_element_type=jnp.float32) + b2_ref[...]
    h2 = jnp.maximum(h2, 0.0)
    # fc3 is padded to a full 128-lane output -> lane-dense matmul + store.
    mean = jnp.dot(h2.astype(jnp.bfloat16), w3_ref[...],
                   preferred_element_type=jnp.float32) + b3_ref[...]   # (bt, OUT)

    if stochastic:
        eps = eps_ref[...]                        # (bt, OUT), zeros on pad lanes
        a = mean + std_ref[...] * eps             # rsample
        lp = -0.5 * (eps * eps) + const_ref[...]  # z == (a-mean)/std == eps exactly
    else:
        a = mean                                  # deterministic: a = mean, eps = 0
        lp = const_ref[...]

    # 2*a + 2*softplus(-2a) == 2*|a| + 2*log1p(exp(-2*|a|))  (stable, branch-free)
    abs_a = jnp.abs(a)
    lp = lp + 2.0 * abs_a + 2.0 * jnp.log1p(jnp.exp(-2.0 * abs_a))

    lane = jax.lax.broadcasted_iota(jnp.int32, a.shape, 1)
    valid = lane < n_actions
    log_pi = jnp.sum(jnp.where(valid, lp, 0.0), axis=-1, keepdims=True)  # (bt, 1)

    a_clip = jnp.clip(a, -max_action, max_action)

    # Pack [action | log_pi | zeros] into one lane-dense (bt, OUT) slab.
    packed = jnp.where(valid, a_clip,
                       jnp.where(lane == n_actions, log_pi, 0.0))
    out_ref[...] = packed.astype(out_ref.dtype)


@functools.partial(jax.jit, static_argnames=("max_action", "deterministic"))
def actor_forward(params, s, eps, max_action, deterministic=False):
    """params: dict of w1,b1,w2,b2,w3,b3,log_std (weights stored as (in, out))."""
    batch, n_states = s.shape
    hidden = params["w1"].shape[1]
    n_actions = params["w3"].shape[1]
    out_lanes = _round_up(n_actions + 1, 128)   # action lanes + 1 log_pi lane
    pad = out_lanes - n_actions

    # Host-side folding / layout prep (fused by XLA under jit).
    w1 = params["w1"].astype(jnp.bfloat16)
    w2 = params["w2"].astype(jnp.bfloat16)
    w3 = jnp.pad(params["w3"], ((0, 0), (0, pad))).astype(jnp.bfloat16)
    b1 = params["b1"]
    b2 = params["b2"]
    b3 = jnp.pad(params["b3"], ((0, 0), (0, pad)))
    log_std = jnp.pad(params["log_std"], ((0, 0), (0, pad)))
    std_row = jnp.exp(log_std)                       # (1, OUT) — once, not per-row
    const_row = -log_std - _LOGPROB_CONST            # (1, OUT) folded constants
    s_bf16 = s.astype(jnp.bfloat16)

    # Batch tiling: one block at small batches, 256-row parallel tiles otherwise.
    bt = 256 if (batch >= 256 and batch % 256 == 0) else batch
    grid = (batch // bt,)

    def batched(shape):
        return pl.BlockSpec(shape, lambda i: (i, 0))

    def resident(shape):
        return pl.BlockSpec(shape, lambda i: (0, 0))

    in_arrays = [s_bf16]
    in_specs = [batched((bt, n_states))]
    if not deterministic:
        eps_p = jnp.pad(eps, ((0, 0), (0, pad)))     # zeros on pad lanes
        in_arrays.append(eps_p)
        in_specs.append(batched((bt, out_lanes)))
    in_arrays += [w1, b1, w2, b2, w3, b3, std_row, const_row]
    in_specs += [
        resident((n_states, hidden)), resident((1, hidden)),
        resident((hidden, hidden)), resident((1, hidden)),
        resident((hidden, out_lanes)), resident((1, out_lanes)),
        resident((1, out_lanes)), resident((1, out_lanes)),
    ]

    kernel = functools.partial(_actor_kernel, float(max_action), int(n_actions),
                               not deterministic)

    packed = pl.pallas_call(
        kernel,
        out_shape=jax.ShapeDtypeStruct((batch, out_lanes), jnp.float32),
        grid=grid,
        in_specs=in_specs,
        out_specs=batched((bt, out_lanes)),
        compiler_params=pltpu.CompilerParams(
            dimension_semantics=("parallel",),
            vmem_limit_bytes=32 * 1024 * 1024,
        ),
    )(*in_arrays)

    a = packed[:, :n_actions]
    log_pi = packed[:, n_actions:n_actions + 1]
    return a, log_pi


def _actor_reference(params, s, eps, max_action, deterministic=False):
    """Pure-JAX mirror of the PyTorch module (same bf16 matmul precision)."""
    def lin(x, w, b):
        return jnp.dot(x.astype(jnp.bfloat16), w.astype(jnp.bfloat16),
                       preferred_element_type=jnp.float32) + b

    h = jax.nn.relu(lin(s, params["w1"], params["b1"]))
    h = jax.nn.relu(lin(h, params["w2"], params["b2"]))
    mean = lin(h, params["w3"], params["b3"])
    log_std = jnp.broadcast_to(params["log_std"], mean.shape)
    std = jnp.exp(log_std)
    a = mean if deterministic else mean + std * eps
    log_prob = (-0.5 * ((a - mean) / std) ** 2 - log_std
                - 0.5 * math.log(2.0 * math.pi))
    log_pi = jnp.sum(log_prob, axis=1, keepdims=True)
    log_pi -= jnp.sum(2.0 * (math.log(2.0) - a - jax.nn.softplus(-2.0 * a)),
                      axis=1, keepdims=True)
    a = jnp.clip(a, -max_action, max_action)
    return a, log_pi


def init_params(key, n_states, hidden_dim, n_actions):
    ks = jax.random.split(key, 6)

    def linear(kw, kb, fan_in, fan_out):
        bound = 1.0 / math.sqrt(fan_in)
        w = jax.random.uniform(kw, (fan_in, fan_out), jnp.float32, -bound, bound)
        b = jax.random.uniform(kb, (1, fan_out), jnp.float32, -bound, bound)
        return w, b

    w1, b1 = linear(ks[0], ks[1], n_states, hidden_dim)
    w2, b2 = linear(ks[2], ks[3], hidden_dim, hidden_dim)
    w3, b3 = linear(ks[4], ks[5], hidden_dim, n_actions)
    log_std = jnp.zeros((1, n_actions), jnp.float32)
    return dict(w1=w1, b1=b1, w2=w2, b2=b2, w3=w3, b3=b3, log_std=log_std)


if __name__ == "__main__":
    # Shapes consistent with the module: batch=2, n_states=8, hidden=32, n_actions=4.
    batch, n_states, hidden_dim, n_actions = 2, 8, 32, 4
    max_action = 1.0

    key = jax.random.PRNGKey(0)
    k_param, k_s, k_eps = jax.random.split(key, 3)
    params = init_params(k_param, n_states, hidden_dim, n_actions)
    s = jax.random.normal(k_s, (batch, n_states), jnp.float32)
    eps = jax.random.normal(k_eps, (batch, n_actions), jnp.float32)

    # Stochastic path (rsample).
    a, log_pi = actor_forward(params, s, eps, max_action=max_action,
                              deterministic=False)
    jax.block_until_ready((a, log_pi))

    # Deterministic path (a = mean; no eps operand is shipped to the kernel).
    a_det, log_pi_det = actor_forward(params, s, eps, max_action=max_action,
                                      deterministic=True)
    jax.block_until_ready((a_det, log_pi_det))

    assert a.shape == (batch, n_actions) and log_pi.shape == (batch, 1)
    assert a_det.shape == (batch, n_actions) and log_pi_det.shape == (batch, 1)

    a_ref, lp_ref = _actor_reference(params, s, eps, max_action, deterministic=False)
    ad_ref, lpd_ref = _actor_reference(params, s, eps, max_action, deterministic=True)
    assert bool(jnp.allclose(a, a_ref, rtol=5e-3, atol=5e-3))
    assert bool(jnp.allclose(log_pi, lp_ref, rtol=5e-3, atol=5e-3))
    assert bool(jnp.allclose(a_det, ad_ref, rtol=5e-3, atol=5e-3))
    assert bool(jnp.allclose(log_pi_det, lpd_ref, rtol=5e-3, atol=5e-3))

    print("KERNEL_OK")
</pallas_src>

<mosaic_0001>
module attributes {stable_mosaic.version = 11 : i64} {
  func.func @_actor_kernel(%arg0: i32, %arg1: memref<2x8xbf16, #tpu.memory_space<vmem>>, %arg2: memref<2x128xf32, #tpu.memory_space<vmem>>, %arg3: memref<8x32xbf16, #tpu.memory_space<vmem>>, %arg4: memref<1x32xf32, #tpu.memory_space<vmem>>, %arg5: memref<32x32xbf16, #tpu.memory_space<vmem>>, %arg6: memref<1x32xf32, #tpu.memory_space<vmem>>, %arg7: memref<32x128xbf16, #tpu.memory_space<vmem>>, %arg8: memref<1x128xf32, #tpu.memory_space<vmem>>, %arg9: memref<1x128xf32, #tpu.memory_space<vmem>>, %arg10: memref<1x128xf32, #tpu.memory_space<vmem>>, %arg11: memref<2x128xf32, #tpu.memory_space<vmem>>) attributes {dimension_semantics = [#tpu.dimension_semantics<parallel>], iteration_bounds = array<i64: 1>, scalar_prefetch = 0 : i64, scratch_operands = 0 : i64, tpu.core_type = #tpu.core_type<tc>, window_params = [{transform_indices = @transform_0, window_bounds = array<i64: 2, 8>}, {transform_indices = @transform_1, window_bounds = array<i64: 2, 128>}, {pipeline_mode = #tpu.pipeline_mode<synchronous>, transform_indices = @transform_2, window_bounds = array<i64: 8, 32>}, {pipeline_mode = #tpu.pipeline_mode<synchronous>, transform_indices = @transform_3, window_bounds = array<i64: 1, 32>}, {pipeline_mode = #tpu.pipeline_mode<synchronous>, transform_indices = @transform_4, window_bounds = array<i64: 32, 32>}, {pipeline_mode = #tpu.pipeline_mode<synchronous>, transform_indices = @transform_5, window_bounds = array<i64: 1, 32>}, {pipeline_mode = #tpu.pipeline_mode<synchronous>, transform_indices = @transform_6, window_bounds = array<i64: 32, 128>}, {pipeline_mode = #tpu.pipeline_mode<synchronous>, transform_indices = @transform_7, window_bounds = array<i64: 1, 128>}, {pipeline_mode = #tpu.pipeline_mode<synchronous>, transform_indices = @transform_8, window_bounds = array<i64: 1, 128>}, {pipeline_mode = #tpu.pipeline_mode<synchronous>, transform_indices = @transform_9, window_bounds = array<i64: 1, 128>}, {transform_indices = @transform_10, window_bounds = array<i64: 2, 128>}]} {
    %c0 = arith.constant 0 : index
    %c0_0 = arith.constant 0 : index
    %0 = vector.load %arg1[%c0, %c0_0] : memref<2x8xbf16, #tpu.memory_space<vmem>>, vector<2x8xbf16>
    %c0_1 = arith.constant 0 : index
    %c0_2 = arith.constant 0 : index
    %1 = vector.load %arg3[%c0_1, %c0_2] : memref<8x32xbf16, #tpu.memory_space<vmem>>, vector<8x32xbf16>
    %cst = arith.constant dense<0.000000e+00> : vector<2x32xf32>
    %2 = tpu.matmul %0, %1, %cst {dimension_numbers = #tpu.dot_dimension_numbers<[1], [0], [0], [1], [0, 0, 1, 1], [], []>} : vector<2x8xbf16>, vector<8x32xbf16>, vector<2x32xf32> -> vector<2x32xf32>
    %c0_3 = arith.constant 0 : index
    %c0_4 = arith.constant 0 : index
    %3 = vector.load %arg4[%c0_3, %c0_4] : memref<1x32xf32, #tpu.memory_space<vmem>>, vector<1x32xf32>
    %4 = vector.broadcast %3 : vector<1x32xf32> to vector<2x32xf32>
    %5 = arith.addf %2, %4 : vector<2x32xf32>
    %cst_5 = arith.constant 0.000000e+00 : f32
    %6 = vector.broadcast %cst_5 : f32 to vector<2x32xf32>
    %7 = arith.maximumf %5, %6 : vector<2x32xf32>
    %8 = arith.truncf %7 : vector<2x32xf32> to vector<2x32xbf16>
    %c0_6 = arith.constant 0 : index
    %c0_7 = arith.constant 0 : index
    %9 = vector.load %arg5[%c0_6, %c0_7] : memref<32x32xbf16, #tpu.memory_space<vmem>>, vector<32x32xbf16>
    %cst_8 = arith.constant dense<0.000000e+00> : vector<2x32xf32>
    %10 = tpu.matmul %8, %9, %cst_8 {dimension_numbers = #tpu.dot_dimension_numbers<[1], [0], [0], [1], [0, 0, 1, 1], [], []>} : vector<2x32xbf16>, vector<32x32xbf16>, vector<2x32xf32> -> vector<2x32xf32>
    %c0_9 = arith.constant 0 : index
    %c0_10 = arith.constant 0 : index
    %11 = vector.load %arg6[%c0_9, %c0_10] : memref<1x32xf32, #tpu.memory_space<vmem>>, vector<1x32xf32>
    %12 = vector.broadcast %11 : vector<1x32xf32> to vector<2x32xf32>
    %13 = arith.addf %10, %12 : vector<2x32xf32>
    %cst_11 = arith.constant 0.000000e+00 : f32
    %14 = vector.broadcast %cst_11 : f32 to vector<2x32xf32>
    %15 = arith.maximumf %13, %14 : vector<2x32xf32>
    %16 = arith.truncf %15 : vector<2x32xf32> to vector<2x32xbf16>
    %c0_12 = arith.constant 0 : index
    %c0_13 = arith.constant 0 : index
    %17 = vector.load %arg7[%c0_12, %c0_13] : memref<32x128xbf16, #tpu.memory_space<vmem>>, vector<32x128xbf16>
    %cst_14 = arith.constant dense<0.000000e+00> : vector<2x128xf32>
    %18 = tpu.matmul %16, %17, %cst_14 {dimension_numbers = #tpu.dot_dimension_numbers<[1], [0], [0], [1], [0, 0, 1, 1], [], []>} : vector<2x32xbf16>, vector<32x128xbf16>, vector<2x128xf32> -> vector<2x128xf32>
    %c0_15 = arith.constant 0 : index
    %c0_16 = arith.constant 0 : index
    %19 = vector.load %arg8[%c0_15, %c0_16] : memref<1x128xf32, #tpu.memory_space<vmem>>, vector<1x128xf32>
    %20 = vector.broadcast %19 : vector<1x128xf32> to vector<2x128xf32>
    %21 = arith.addf %18, %20 : vector<2x128xf32>
    %c0_17 = arith.constant 0 : index
    %c0_18 = arith.constant 0 : index
    %22 = vector.load %arg2[%c0_17, %c0_18] : memref<2x128xf32, #tpu.memory_space<vmem>>, vector<2x128xf32>
    %c0_19 = arith.constant 0 : index
    %c0_20 = arith.constant 0 : index
    %23 = vector.load %arg9[%c0_19, %c0_20] : memref<1x128xf32, #tpu.memory_space<vmem>>, vector<1x128xf32>
    %24 = vector.broadcast %23 : vector<1x128xf32> to vector<2x128xf32>
    %25 = arith.mulf %24, %22 : vector<2x128xf32>
    %26 = arith.addf %21, %25 : vector<2x128xf32>
    %27 = arith.mulf %22, %22 : vector<2x128xf32>
    %cst_21 = arith.constant -5.000000e-01 : f32
    %28 = vector.broadcast %cst_21 : f32 to vector<2x128xf32>
    %29 = arith.mulf %28, %27 : vector<2x128xf32>
    %c0_22 = arith.constant 0 : index
    %c0_23 = arith.constant 0 : index
    %30 = vector.load %arg10[%c0_22, %c0_23] : memref<1x128xf32, #tpu.memory_space<vmem>>, vector<1x128xf32>
    %31 = vector.broadcast %30 : vector<1x128xf32> to vector<2x128xf32>
    %32 = arith.addf %29, %31 : vector<2x128xf32>
    %33 = math.absf %26 : vector<2x128xf32>
    %cst_24 = arith.constant 2.000000e+00 : f32
    %34 = vector.broadcast %cst_24 : f32 to vector<2x128xf32>
    %35 = arith.mulf %34, %33 : vector<2x128xf32>
    %36 = arith.addf %32, %35 : vector<2x128xf32>
    %cst_25 = arith.constant -2.000000e+00 : f32
    %37 = vector.broadcast %cst_25 : f32 to vector<2x128xf32>
    %38 = arith.mulf %37, %33 : vector<2x128xf32>
    %39 = math.exp %38 : vector<2x128xf32>
    %40 = math.log1p %39 : vector<2x128xf32>
    %cst_26 = arith.constant 2.000000e+00 : f32
    %41 = vector.broadcast %cst_26 : f32 to vector<2x128xf32>
    %42 = arith.mulf %41, %40 : vector<2x128xf32>
    %43 = arith.addf %36, %42 : vector<2x128xf32>
    %44 = tpu.iota {dimensions = array<i32: 1>} : vector<2x128xi32>
    %c4_i32 = arith.constant 4 : i32
    %45 = vector.broadcast %c4_i32 : i32 to vector<2x128xi32>
    %46 = arith.cmpi slt, %44, %45 : vector<2x128xi32>
    %cst_27 = arith.constant 0.000000e+00 : f32
    %47 = vector.broadcast %cst_27 : f32 to vector<2x128xf32>
    %48 = arith.select %46, %43, %47 : vector<2x128xi1>, vector<2x128xf32>
    %cst_28 = arith.constant dense<0.000000e+00> : vector<2xf32>
    %49 = vector.multi_reduction <add>, %48, %cst_28 [1] : vector<2x128xf32> to vector<2xf32>
    %50 = vector.shape_cast %49 : vector<2xf32> to vector<2x1xf32>
    %cst_29 = arith.constant -1.000000e+00 : f32
    %cst_30 = arith.constant 1.000000e+00 : f32
    %51 = vector.broadcast %cst_29 : f32 to vector<2x128xf32>
    %52 = arith.maximumf %51, %26 : vector<2x128xf32>
    %53 = vector.broadcast %cst_30 : f32 to vector<2x128xf32>
    %54 = arith.minimumf %53, %52 : vector<2x128xf32>
    %c4_i32_31 = arith.constant 4 : i32
    %55 = vector.broadcast %c4_i32_31 : i32 to vector<2x128xi32>
    %56 = arith.cmpi eq, %44, %55 : vector<2x128xi32>
    %cst_32 = arith.constant 0.000000e+00 : f32
    %57 = vector.shape_cast %50 : vector<2x1xf32> to vector<2x1xf32>
    %58 = vector.broadcast %57 : vector<2x1xf32> to vector<2x128xf32>
    %59 = vector.broadcast %cst_32 : f32 to vector<2x128xf32>
    %60 = arith.select %56, %58, %59 : vector<2x128xi1>, vector<2x128xf32>
    %61 = arith.select %46, %54, %60 : vector<2x128xi1>, vector<2x128xf32>
    %c0_33 = arith.constant 0 : index
    %c0_34 = arith.constant 0 : index
    %62 = vector.load %arg11[%c0_33, %c0_34] : memref<2x128xf32, #tpu.memory_space<vmem>>, vector<2x128xf32>
    tpu.vector_store %arg11[%c0_33, %c0_34], %61 {strides = array<i32>} : memref<2x128xf32, #tpu.memory_space<vmem>>, vector<2x128xf32>,
    return
  }
  func.func @transform_0(%arg0: i32) -> (i32, i32) {
    %c0_i32 = arith.constant 0 : i32
    %c0_i32_0 = arith.constant 0 : i32
    return %arg0, %c0_i32 : i32, i32
  }
  func.func @transform_1(%arg0: i32) -> (i32, i32) {
    %c0_i32 = arith.constant 0 : i32
    %c0_i32_0 = arith.constant 0 : i32
    return %arg0, %c0_i32 : i32, i32
  }
  func.func @transform_2(%arg0: i32) -> (i32, i32) {
    %c0_i32 = arith.constant 0 : i32
    %c0_i32_0 = arith.constant 0 : i32
    %c0_i32_1 = arith.constant 0 : i32
    return %c0_i32, %c0_i32_0 : i32, i32
  }
  func.func @transform_3(%arg0: i32) -> (i32, i32) {
    %c0_i32 = arith.constant 0 : i32
    %c0_i32_0 = arith.constant 0 : i32
    %c0_i32_1 = arith.constant 0 : i32
    return %c0_i32, %c0_i32_0 : i32, i32
  }
  func.func @transform_4(%arg0: i32) -> (i32, i32) {
    %c0_i32 = arith.constant 0 : i32
    %c0_i32_0 = arith.constant 0 : i32
    %c0_i32_1 = arith.constant 0 : i32
    return %c0_i32, %c0_i32_0 : i32, i32
  }
  func.func @transform_5(%arg0: i32) -> (i32, i32) {
    %c0_i32 = arith.constant 0 : i32
    %c0_i32_0 = arith.constant 0 : i32
    %c0_i32_1 = arith.constant 0 : i32
    return %c0_i32, %c0_i32_0 : i32, i32
  }
  func.func @transform_6(%arg0: i32) -> (i32, i32) {
    %c0_i32 = arith.constant 0 : i32
    %c0_i32_0 = arith.constant 0 : i32
    %c0_i32_1 = arith.constant 0 : i32
    return %c0_i32, %c0_i32_0 : i32, i32
  }
  func.func @transform_7(%arg0: i32) -> (i32, i32) {
    %c0_i32 = arith.constant 0 : i32
    %c0_i32_0 = arith.constant 0 : i32
    %c0_i32_1 = arith.constant 0 : i32
    return %c0_i32, %c0_i32_0 : i32, i32
  }
  func.func @transform_8(%arg0: i32) -> (i32, i32) {
    %c0_i32 = arith.constant 0 : i32
    %c0_i32_0 = arith.constant 0 : i32
    %c0_i32_1 = arith.constant 0 : i32
    return %c0_i32, %c0_i32_0 : i32, i32
  }
  func.func @transform_9(%arg0: i32) -> (i32, i32) {
    %c0_i32 = arith.constant 0 : i32
    %c0_i32_0 = arith.constant 0 : i32
    %c0_i32_1 = arith.constant 0 : i32
    return %c0_i32, %c0_i32_0 : i32, i32
  }
  func.func @transform_10(%arg0: i32) -> (i32, i32) {
    %c0_i32 = arith.constant 0 : i32
    %c0_i32_0 = arith.constant 0 : i32
    return %arg0, %c0_i32 : i32, i32
  }
}

</mosaic_0001>

<bundles_post_ra>
// kernel: actor_forward.1
= control target key start
LH: loop header
LB: loop body
LE: loop exit
PB: predicated region body
PF: predicated region fallthrough
CT: control target
= control target key end

     0   :  { %vm49_vm0 = vcmask 1043456   ;;  %v338_v0 = vmov 0.0   ;;  %vm339_vm1 = vmmov 0   ;;  %vm45_vm2 = vcmask 64512   ;;  %s434_s2 = inlined_call_operand.vmem [shape: bf16[8,32], index: 2, kind: input, shape index: {}]   ;;  %s435_s0 = inlined_call_operand.vmem [shape: bf16[2,8], index: 0, kind: input, shape index: {}]   ;;  %s436_s4 = inlined_call_operand.vmem [shape: bf16[32,32], index: 4, kind: input, shape index: {}]   ;;  %s437_s6 = inlined_call_operand.vmem [shape: bf16[32,128], index: 6, kind: input, shape index: {}]   ;;  %s438_s3 = inlined_call_operand.vmem [shape: f32[1,32], index: 3, kind: input, shape index: {}]   ;;  %s439_s5 = inlined_call_operand.vmem [shape: f32[1,32], index: 5, kind: input, shape index: {}]   ;;  %s440_s1 = inlined_call_operand.vmem [shape: f32[2,128], index: 1, kind: input, shape index: {}]   ;;  %s441_s8 = inlined_call_operand.vmem [shape: f32[1,128], index: 8, kind: input, shape index: {}]   ;;  %s442_s7 = inlined_call_operand.vmem [shape: f32[1,128], index: 7, kind: input, shape index: {}]   ;;  %s443_s9 = inlined_call_operand.vmem [shape: f32[1,128], index: 9, kind: input, shape index: {}]   ;;  %s444_s10 = inlined_call_operand.vmem [shape: f32[2,128], index: 10, kind: output, shape index: {}]  }
   0x1   :  { %306 = vmatprep.subr.bf16.mxu0 %v338_v0  ;;  %v37_v1 = vld [vmem:[%s434_s2] sm:$0xf]  ;;  %308 = vmatprep.mubr.msk.bf16.mxu0 %vm339_vm1, %v338_v0  ;;  %v330_v4 = vld [vmem:[%s436_s4 + $0x8] sm:$0xff]   ;;  %vm118_vm3 = vcmask 261120   ;;  %v267_v44 = vlaneseq  ;;  %vm271_vm6 = vcmask 1041408  }
   0x2   :  { %v51_v2 = vsel %vm49_vm0, %v37_v1, 0  ;;  %312 = vmatprep.subr.bf16.mxu1 %v338_v0  ;;  %316 = vmatprep.mubr.msk.bf16.mxu1 %vm339_vm1, %v338_v0  ;;  %v36_v3 = vld [vmem:[%s435_s0] sm:$0x1]  ;;  %v332_v6 = vld [vmem:[%s437_s6 + $0x8] sm:$0xff]  }
   0x3   :  { %307 = vmatpush3.bf16.msra.mxu0 %v51_v2  ;;  %313 = vmatpush3.bf16.msra.mxu1 %v330_v4  ;;  %v331_v5 = vld [vmem:[%s436_s4] sm:$0xff]   ;;  %v268_v51 = vand.u32 127, %v267_v44 }
   0x4   :  { %320 = vmatprep.subr.bf16.mxu0 %v338_v0  ;;  %314 = vmatprep.subr.bf16.mxu1 %v338_v0  ;;  %v285_v7 = vld [vmem:[%s438_s3] ss:$0 sm:$0xff] }
   0x5   :  { %v333_v15 = vld [vmem:[%s437_s6] sm:$0xff]   ;;  %vm269_vm5 = vcmp.lt.s32.totalorder %v268_v51, 4  ;;  %vm277_vm7 = vcmp.eq.s32.totalorder %v268_v51, 4 }
   0x6   :  { %309 = vmatmul.mubr.msk.bf16.vlgmr.msra.gmra.mxu0 %vm45_vm2, %v36_v3  ;;  %v287_v16 = vld [vmem:[%s439_s5] ss:$0 sm:$0xff] }
   0x7   :  { %324 = vmatprep.mubr.msk.bf16.mxu0 %vm339_vm1, %v338_v0  ;;  %315 = vmatpush3.bf16.msra.mxu1 %v331_v5  ;;  %v230_v24 = vld [vmem:[%s440_s1] sm:$0x3] }
   0x8   :  { %321 = vmatpush3.bf16.msra.mxu0 %v332_v6  ;;  %v295_v25 = vld [vmem:[%s441_s8] ss:$0 sm:$0xff]  ;;  %v240_v39 = vmul.f32 %v230_v24, %v230_v24 }
   0x9   :  { %322 = vmatprep.subr.bf16.mxu0 %v338_v0  ;;  %v291_v26 = vld [vmem:[%s442_s7] ss:$0 sm:$0xff]  ;;  %v238_v27 = vmul.f32 %v295_v25, %v230_v24 }
   0xa   :  { %v241_v41 = vmul.f32 -0.5, %v240_v39  ;;  %v296_v42 = vld [vmem:[%s443_s9] ss:$0 sm:$0xff] }
   0xc   :  { %323 = vmatpush3.bf16.msra.mxu0 %v333_v15  ;;  %v249_v48 = vadd.f32 %v296_v42, %v241_v41 }
  0xc6   :  { %v87_v8 = vpop.f32.mrf.mxu0 }
  0xc7   :  { %v88_v9 = vadd.f32 %v285_v7, %v87_v8 }
  0xc8   :  { %v310_v10 = vpop.f32.mrf.mxu0 }
  0xc9   :  { %v93_v11 = vmax.f32 %v88_v9, 0.0 }
  0xca   :  { %v90_v12 = vpop.f32.mrf.mxu0 }
  0xcb   :  { %v94_v13 = vpack.c.bf16 %v93_v11, %v93_v11 }
  0xcc   :  { %v311_v14 = vpop.f32.mrf.mxu0 }
  0xcd   :  { %317 = vmatmul.mubr.msk.bf16.vlgmr.msra.gmra.mxu1 %vm118_vm3, %v94_v13 }
 0x18d   :  { %v156_v17 = vpop.f32.mrf.mxu1 }
 0x18e   :  { %v157_v18 = vadd.f32 %v287_v16, %v156_v17 }
 0x18f   :  { %v318_v19 = vpop.f32.mrf.mxu1 }
 0x190   :  { %v162_v20 = vmax.f32 %v157_v18, 0.0 }
 0x191   :  { %v159_v21 = vpop.f32.mrf.mxu1 }
 0x192   :  { %v163_v22 = vpack.c.bf16 %v162_v20, %v162_v20 }
 0x193   :  { %v319_v23 = vpop.f32.mrf.mxu1 }
 0x194   :  { %325 = vmatmul.mubr.msk.bf16.vlgmr.msra.gmra.mxu0 %vm118_vm3, %v163_v22 }
 0x254   :  { %v224_v28 = vpop.f32.mrf.mxu0 }
 0x255   :  { %v225_v29 = vadd.f32 %v291_v26, %v224_v28 }
 0x256   :  { %v326_v30 = vpop.f32.mrf.mxu0 }
 0x257   :  { %v239_v31 = vadd.f32 %v238_v27, %v225_v29 }
 0x258   :  { %v227_v32 = vpop.f32.mrf.mxu0 }
 0x259   :  { %v250_v33 = vand.u32 2147483647, %v239_v31  ;;  %v297_v58 = vclamps-f32 %v239_v31, 1.0 }
 0x25a   :  { %v327_v34 = vpop.f32.mrf.mxu0 }
 0x25b   :  { %v253_v35 = vmul.f32 -2.0, %v250_v33  ;;  %v251_v47 = vmul.f32 2.0, %v250_v33 }
 0x25d   :  { %v254_v36 = vmul.f32 1.442695, %v253_v35  ;;  %v252_v53 = vadd.f32 %v251_v47, %v249_v48 }
 0x25f   :  { %334 = vpow2.f32 %v254_v36 }
 0x26c   :  { %v335_v37 = vpop.eup %334 }
 0x26d   :  { %v256_v38 = vadd.f32 1.0, %v335_v37  ;;  %v259_v40 = vmul.f32 -0.5, %v335_v37  ;;  %v262_v45 = vand.u32 2147483647, %v335_v37 }
 0x26f   :  { %336 = vlog2.f32 %v256_v38  ;;  %v260_v43 = vadd.f32 1.0, %v259_v40  ;;  %vm263_vm4 = vcmp.lt.f32.partialorder %v262_v45, 0.0004427343 }
 0x271   :  { %v261_v50 = vmul.f32 %v335_v37, %v260_v43 }
 0x27c   :  { %v337_v46 = vpop.eup %336 }
 0x27d   :  { %v258_v49 = vmul.f32 0.6931472, %v337_v46 }
 0x27f   :  { %v264_v52 = vsel %vm263_vm4, %v261_v50, %v258_v49 }
 0x280   :  { %v265_v54 = vmul.f32 2.0, %v264_v52 }
 0x282   :  { %v266_v55 = vadd.f32 %v265_v54, %v252_v53 }
 0x284   :  { %v270_v56 = vsel %vm269_vm5, %v266_v55, 0.0 }
 0x285   :  { %v272_v57 = vsel %vm271_vm6, %v270_v56, 0.0 }
 0x286   :  { %273 = vadd.xlane.f32.xlu0 %v272_v57 }
 0x30f   :  { %v274_v59 = vpop.xlane.xlu0 %273 }
 0x310   :  { %v278_v60 = vsel %vm277_vm7, %v274_v59, 0.0 }
 0x311   :  { %v279_v61 = vsel %vm269_vm5, %v297_v58, %v278_v60 }
 0x312   :  { %280 = vst [vmem:[%s444_s10] sm:$0x3] %v279_v61 }

</bundles_post_ra>
